<compile_context>
chip_gen: v7x
topology: tpu7x:2x2x1
jax: 0.10.0
libtpu: 0.0.40
codegen_flags: <defaults>
</compile_context>

<pallas_src>
import functools

import jax
import jax.numpy as jnp
import numpy as np
from jax.experimental import pallas as pl
from jax.experimental.pallas import tpu as pltpu

TAU = 2.0            # LIF time constant (spikingjelly default)
INV_TAU = 1.0 / TAU  # precomputed: avoids a divide on the sequential critical path


# ----------------------------- Pallas kernel --------------------------------

def _ssa_fused_kernel(x_ref, w_qkv_ref, b_qkv_ref, mask_ref, w_proj_ref, b_proj_ref,
                      o_ref, qkv_vmem, attn_vmem, proj_vmem, *,
                      seq_len, qkv_threshold, attn_threshold, proj_threshold, scale):
    """Fused SSA step for one (tile_b sequences, one timestep) block.

    Grid: (B_tiles ["parallel"], T ["arbitrary"]).
      x_ref:      (rows, C)  f32   where rows = tile_b * N (channels-last, lane-dense)
      w_qkv_ref:  (C, 3C)    bf16  folded [Wq|Wk|Wv]      b_qkv_ref: (1, 3C) f32
      mask_ref:   (C, C)     f32   head block-diagonal 0/1 mask
      w_proj_ref: (C, C)     bf16  folded proj            b_proj_ref: (1, C) f32
      o_ref:      (rows, C)  bf16  final 0/1 spikes
    All three LIF membranes live in VMEM scratch, carried across the sequential T axis.
    """
    t = pl.program_id(1)

    @pl.when(t == 0)
    def _():
        qkv_vmem[...] = jnp.zeros_like(qkv_vmem)
        attn_vmem[...] = jnp.zeros_like(attn_vmem)
        proj_vmem[...] = jnp.zeros_like(proj_vmem)

    rows, C = o_ref.shape
    N = seq_len
    tb = rows // N

    # ---- stage 1: fused q/k/v projection (+ folded BN) + LIF -------------------------
    # x is f32 in HBM (matches the module input); cast to bf16 for the MXU, f32 accumulate.
    x = x_ref[...].astype(jnp.bfloat16)
    y = jnp.dot(x, w_qkv_ref[...], preferred_element_type=jnp.float32) + b_qkv_ref[...]

    vq = qkv_vmem[...] + (y - qkv_vmem[...]) * INV_TAU
    fired = vq >= qkv_threshold
    qkv_vmem[...] = jnp.where(fired, 0.0, vq)           # hard reset to 0
    qkv_sp = fired.astype(jnp.bfloat16)                 # (rows, 3C) 0/1 spikes, stays on-chip

    # ---- stage 2: softmax-free attention (kv-first, head block-diag) -----------------
    #   per head:  y_h = scale * q_h @ (k_hᵀ @ v_h)
    #   rewritten: y   = scale * q @ (mask ⊙ (kᵀ @ v))   -- one lane-dense (N,C)x(C,C) matmul
    # per batch element instead of H head_dim-wide, lane-misaligned matmuls + masked stores.
    mask = mask_ref[...]
    ys = []
    for bi in range(tb):                                 # static unroll over sequences in the block
        r = slice(bi * N, (bi + 1) * N)                  # sublane-aligned row slice
        qb = qkv_sp[r, 0 * C:1 * C]
        kb = qkv_sp[r, 1 * C:2 * C]
        vb = qkv_sp[r, 2 * C:3 * C]
        kv = jax.lax.dot_general(kb, vb, (((0,), (0,)), ((), ())),
                                 preferred_element_type=jnp.float32)   # (C, C), integer-valued
        kv = (kv * mask).astype(jnp.bfloat16)            # exact for 0/1 spikes while N <= 256
        ys.append(jnp.dot(qb, kv, preferred_element_type=jnp.float32))  # (N, C)
    y_att = (jnp.concatenate(ys, axis=0) if tb > 1 else ys[0]) * scale  # scale after f32 accumulate

    # ---- attention LIF (threshold 0.5) ------------------------------------------------
    va = attn_vmem[...] + (y_att - attn_vmem[...]) * INV_TAU
    fired_a = va >= attn_threshold
    attn_vmem[...] = jnp.where(fired_a, 0.0, va)
    attn_sp = fired_a.astype(jnp.bfloat16)

    # ---- stage 3: output projection (+ folded BN) + proj LIF --------------------------
    yp = jnp.dot(attn_sp, w_proj_ref[...], preferred_element_type=jnp.float32) + b_proj_ref[...]
    vp = proj_vmem[...] + (yp - proj_vmem[...]) * INV_TAU
    fired_p = vp >= proj_threshold
    proj_vmem[...] = jnp.where(fired_p, 0.0, vp)
    o_ref[...] = fired_p.astype(o_ref.dtype)             # bf16 0/1 spikes (exact, half the HBM writes)


# ----------------------------- tile selection --------------------------------

def _pick_tile_b(B, N, C, target_rows=1024, vmem_budget_bytes=14 * 1024 * 1024):
    """Largest divisor tb of B such that the per-step block (tb*N rows) stays within the
    row target and a conservative VMEM budget (fits v5e/v6e/v7x scoped defaults without
    raising vmem_limit_bytes).  Prefers 16-row-aligned tiles (bf16 sublane packing).
    Never silently returns an over-budget tile; worst case falls back to tb = 1."""
    C3 = 3 * C

    def est_vmem(tb):
        rows = tb * N
        io_blocks = 2 * rows * C * 4 + 2 * rows * C * 2               # double-buffered x (f32) + out (bf16)
        weights = 2 * ((C * C3 + C * C) * 2 + (C3 + C) * 4 + C * C * 4)  # w_qkv, w_proj, biases, mask
        membranes = rows * C3 * 4 + 2 * rows * C * 4                  # three LIF membranes
        temps = rows * C3 * 6 + C * C * 6 + rows * C * 8              # qkv spikes, kv tile, y_att (rough)
        return io_blocks + weights + membranes + temps

    valid = []
    for tb in range(1, B + 1):
        if B % tb:
            continue
        rows = tb * N
        if rows % 8 != 0 and tb != B:        # keep the sublane dim 8-aligned (tb == B is always legal)
            continue
        if rows > max(target_rows, N):
            continue
        if est_vmem(tb) > vmem_budget_bytes and tb != 1:
            continue
        valid.append(tb)
    if not valid:
        return 1
    aligned = [tb for tb in valid if (tb * N) % 16 == 0]
    return max(aligned) if aligned else max(valid)


# ------------------------------ SSA forward ---------------------------------

def ssa_forward(x, params, num_heads, scale=0.125, target_rows=1024):
    """x: (T, B, N, C) float32. Returns (T, B, N, C) bfloat16 spikes (exact 0/1)."""
    T, B, N, C = x.shape
    D = C // num_heads
    C3 = 3 * C

    # One fused projection: [Wq | Wk | Wv] -> (C, 3C); bf16 operands for the MXU.
    w_qkv = jnp.concatenate(
        [params["q"][0], params["k"][0], params["v"][0]], axis=1).astype(jnp.bfloat16)
    b_qkv = jnp.concatenate(
        [params["q"][1], params["k"][1], params["v"][1]], axis=1)      # (1, 3C) f32
    w_proj = params["proj"][0].astype(jnp.bfloat16)                    # (C, C)
    b_proj = params["proj"][1]                                         # (1, C)

    # Head block-diagonal 0/1 mask: mask[c1, c2] = (c1 and c2 belong to the same head).
    head_ids = jnp.arange(C, dtype=jnp.int32) // D
    mask = (head_ids[:, None] == head_ids[None, :]).astype(jnp.float32)

    tile_b = _pick_tile_b(B, N, C, target_rows=target_rows)
    rows = tile_b * N
    x_flat = x.reshape(T, B * N, C)                                    # free reshape (no transpose)

    kernel = functools.partial(
        _ssa_fused_kernel, seq_len=N, qkv_threshold=1.0,
        attn_threshold=0.5, proj_threshold=1.0, scale=scale)

    out = pl.pallas_call(
        kernel,
        out_shape=jax.ShapeDtypeStruct((T, B * N, C), jnp.bfloat16),
        grid_spec=pltpu.PrefetchScalarGridSpec(
            num_scalar_prefetch=0,
            grid=(B // tile_b, T),                    # T innermost: sequential LIF state
            in_specs=[
                pl.BlockSpec((None, rows, C), lambda i, t: (t, i, 0)),
                pl.BlockSpec((C, C3), lambda i, t: (0, 0)),
                pl.BlockSpec((1, C3), lambda i, t: (0, 0)),
                pl.BlockSpec((C, C), lambda i, t: (0, 0)),
                pl.BlockSpec((C, C), lambda i, t: (0, 0)),
                pl.BlockSpec((1, C), lambda i, t: (0, 0)),
            ],
            out_specs=pl.BlockSpec((None, rows, C), lambda i, t: (t, i, 0)),
            scratch_shapes=[
                pltpu.VMEM((rows, C3), jnp.float32),   # q/k/v LIF membrane
                pltpu.VMEM((rows, C), jnp.float32),    # attn LIF membrane
                pltpu.VMEM((rows, C), jnp.float32),    # proj LIF membrane
            ],
        ),
        compiler_params=pltpu.CompilerParams(
            dimension_semantics=("parallel", "arbitrary")),
    )(x_flat, w_qkv, b_qkv, mask, w_proj, b_proj)

    return out.reshape(T, B, N, C)


# --------------------------- parameter construction -------------------------

def init_linear_bn(key, dim, eps=1e-5):
    """Deterministic Linear(dim, dim) + BatchNorm1d(dim), folded for inference."""
    kw, kb, kg, kbe, km, kv = jax.random.split(key, 6)
    bound = 1.0 / np.sqrt(dim)
    W = jax.random.uniform(kw, (dim, dim), jnp.float32, -bound, bound)   # torch (out, in)
    b = jax.random.uniform(kb, (dim,), jnp.float32, -bound, bound)
    gamma = jax.random.uniform(kg, (dim,), jnp.float32, 0.5, 1.5)
    beta = jax.random.uniform(kbe, (dim,), jnp.float32, -0.1, 0.1)
    mean = jax.random.uniform(km, (dim,), jnp.float32, -0.1, 0.1)
    var = jax.random.uniform(kv, (dim,), jnp.float32, 0.5, 1.5)
    s = gamma / jnp.sqrt(var + eps)
    w_eff = W.T * s[None, :]                   # y = x @ W.T, BN folds per output channel
    b_eff = ((b - mean) * s + beta)[None, :]
    return w_eff, b_eff


# ----------------------------- pure-JAX reference ---------------------------

def _lif_scan(x, v_threshold):
    def step(vm, xt):
        vm = vm + (xt - vm) / TAU
        s = (vm >= v_threshold).astype(xt.dtype)
        return vm * (1.0 - s), s
    _, spikes = jax.lax.scan(step, jnp.zeros_like(x[0]), x)
    return spikes


def ssa_reference(x, params, num_heads, scale=0.125):
    T, B, N, C = x.shape
    H, D = num_heads, C // num_heads
    hp = jax.lax.Precision.HIGHEST

    def lin(xf, w, b):
        return jnp.matmul(xf, w, precision=hp) + b

    q = _lif_scan(lin(x, *params["q"]), 1.0)
    k = _lif_scan(lin(x, *params["k"]), 1.0)
    v = _lif_scan(lin(x, *params["v"]), 1.0)

    def heads(s):
        return s.reshape(T, B, N, H, D).transpose(0, 1, 3, 2, 4)

    qh, kh, vh = heads(q), heads(k), heads(v)
    attn = jnp.einsum("tbhnd,tbhmd->tbhnm", qh, kh, precision=hp) * scale
    y = jnp.einsum("tbhnm,tbhmd->tbhnd", attn, vh, precision=hp)
    y = y.transpose(0, 1, 3, 2, 4).reshape(T, B, N, C)
    y = _lif_scan(y, 0.5)
    out = _lif_scan(lin(y, *params["proj"]), 1.0)
    return out


# ----------------------------------- main -----------------------------------

if __name__ == "__main__":
    T, B, N, C, H = 2, 2, 16, 64, 4     # dim=64, num_heads=4 -> head_dim=16

    key = jax.random.PRNGKey(0)
    kx, kq, kk, kv, kp = jax.random.split(key, 5)
    x = jax.random.normal(kx, (T, B, N, C), jnp.float32)
    params = {
        "q": init_linear_bn(kq, C),
        "k": init_linear_bn(kk, C),
        "v": init_linear_bn(kv, C),
        "proj": init_linear_bn(kp, C),
    }

    out = jax.block_until_ready(ssa_forward(x, params, num_heads=H))
    assert out.shape == (T, B, N, C)
    assert out.dtype == jnp.bfloat16

    ref = jax.block_until_ready(ssa_reference(x, params, num_heads=H))
    # Spike outputs are 0/1; tolerate a tiny fraction of threshold-boundary flips
    # (bf16 weights / MXU precision vs. the HIGHEST-precision f32 reference).
    mismatch = float(jnp.mean(jnp.abs(out.astype(jnp.float32) - ref) > 0.5))
    assert mismatch <= 0.05, f"spike mismatch fraction too high: {mismatch}"

    print("KERNEL_OK")
</pallas_src>

<mosaic_0001>
module attributes {stable_mosaic.version = 11 : i64} {
  func.func @_ssa_fused_kernel(%arg0: i32, %arg1: i32, %arg2: memref<1x32x64xf32, #tpu.memory_space<vmem>>, %arg3: memref<64x192xbf16, #tpu.memory_space<vmem>>, %arg4: memref<1x192xf32, #tpu.memory_space<vmem>>, %arg5: memref<64x64xf32, #tpu.memory_space<vmem>>, %arg6: memref<64x64xbf16, #tpu.memory_space<vmem>>, %arg7: memref<1x64xf32, #tpu.memory_space<vmem>>, %arg8: memref<1x32x64xbf16, #tpu.memory_space<vmem>>, %arg9: memref<32x192xf32, #tpu.memory_space<vmem>>, %arg10: memref<32x64xf32, #tpu.memory_space<vmem>>, %arg11: memref<32x64xf32, #tpu.memory_space<vmem>>) attributes {dimension_semantics = [#tpu.dimension_semantics<parallel>, #tpu.dimension_semantics<arbitrary>], iteration_bounds = array<i64: 1, 2>, scalar_prefetch = 0 : i64, scratch_operands = 3 : i64, tpu.core_type = #tpu.core_type<tc>, window_params = [{transform_indices = @transform_0, window_bounds = array<i64: 1, 32, 64>}, {pipeline_mode = #tpu.pipeline_mode<synchronous>, transform_indices = @transform_1, window_bounds = array<i64: 64, 192>}, {pipeline_mode = #tpu.pipeline_mode<synchronous>, transform_indices = @transform_2, window_bounds = array<i64: 1, 192>}, {pipeline_mode = #tpu.pipeline_mode<synchronous>, transform_indices = @transform_3, window_bounds = array<i64: 64, 64>}, {pipeline_mode = #tpu.pipeline_mode<synchronous>, transform_indices = @transform_4, window_bounds = array<i64: 64, 64>}, {pipeline_mode = #tpu.pipeline_mode<synchronous>, transform_indices = @transform_5, window_bounds = array<i64: 1, 64>}, {transform_indices = @transform_6, window_bounds = array<i64: 1, 32, 64>}]} {
    %c0_i32 = arith.constant 0 : i32
    %0 = arith.cmpi eq, %arg1, %c0_i32 : i32
    %1 = arith.extui %0 : i1 to i32
    %c0_i32_0 = arith.constant 0 : i32
    %2 = arith.cmpi ne, %1, %c0_i32_0 : i32
    scf.if %2 {
      %cst_49 = arith.constant 0.000000e+00 : f32
      %79 = vector.broadcast %cst_49 : f32 to vector<32x192xf32>
      %c0_50 = arith.constant 0 : index
      %c0_51 = arith.constant 0 : index
      %80 = vector.load %arg9[%c0_50, %c0_51] : memref<32x192xf32, #tpu.memory_space<vmem>>, vector<32x192xf32>
      tpu.vector_store %arg9[%c0_50, %c0_51], %79 {strides = array<i32>} : memref<32x192xf32, #tpu.memory_space<vmem>>, vector<32x192xf32>,
      %cst_52 = arith.constant 0.000000e+00 : f32
      %81 = vector.broadcast %cst_52 : f32 to vector<32x64xf32>
      %c0_53 = arith.constant 0 : index
      %c0_54 = arith.constant 0 : index
      %82 = vector.load %arg10[%c0_53, %c0_54] : memref<32x64xf32, #tpu.memory_space<vmem>>, vector<32x64xf32>
      tpu.vector_store %arg10[%c0_53, %c0_54], %81 {strides = array<i32>} : memref<32x64xf32, #tpu.memory_space<vmem>>, vector<32x64xf32>,
      %cst_55 = arith.constant 0.000000e+00 : f32
      %83 = vector.broadcast %cst_55 : f32 to vector<32x64xf32>
      %c0_56 = arith.constant 0 : index
      %c0_57 = arith.constant 0 : index
      %84 = vector.load %arg11[%c0_56, %c0_57] : memref<32x64xf32, #tpu.memory_space<vmem>>, vector<32x64xf32>
      tpu.vector_store %arg11[%c0_56, %c0_57], %83 {strides = array<i32>} : memref<32x64xf32, #tpu.memory_space<vmem>>, vector<32x64xf32>,
    } else {
    }
    %c0 = arith.constant 0 : index
    %c0_1 = arith.constant 0 : index
    %c0_2 = arith.constant 0 : index
    %3 = vector.load %arg2[%c0, %c0_1, %c0_2] : memref<1x32x64xf32, #tpu.memory_space<vmem>>, vector<1x32x64xf32>
    %4 = vector.shape_cast %3 : vector<1x32x64xf32> to vector<32x64xf32>
    %5 = arith.truncf %4 : vector<32x64xf32> to vector<32x64xbf16>
    %c0_3 = arith.constant 0 : index
    %c0_4 = arith.constant 0 : index
    %6 = vector.load %arg3[%c0_3, %c0_4] : memref<64x192xbf16, #tpu.memory_space<vmem>>, vector<64x192xbf16>
    %cst = arith.constant dense<0.000000e+00> : vector<32x192xf32>
    %7 = tpu.matmul %5, %6, %cst {dimension_numbers = #tpu.dot_dimension_numbers<[1], [0], [0], [1], [0, 0, 1, 1], [], []>} : vector<32x64xbf16>, vector<64x192xbf16>, vector<32x192xf32> -> vector<32x192xf32>
    %c0_5 = arith.constant 0 : index
    %c0_6 = arith.constant 0 : index
    %8 = vector.load %arg4[%c0_5, %c0_6] : memref<1x192xf32, #tpu.memory_space<vmem>>, vector<1x192xf32>
    %9 = vector.broadcast %8 : vector<1x192xf32> to vector<32x192xf32>
    %10 = arith.addf %7, %9 : vector<32x192xf32>
    %c0_7 = arith.constant 0 : index
    %c0_8 = arith.constant 0 : index
    %11 = vector.load %arg9[%c0_7, %c0_8] : memref<32x192xf32, #tpu.memory_space<vmem>>, vector<32x192xf32>
    %c0_9 = arith.constant 0 : index
    %c0_10 = arith.constant 0 : index
    %12 = vector.load %arg9[%c0_9, %c0_10] : memref<32x192xf32, #tpu.memory_space<vmem>>, vector<32x192xf32>
    %13 = arith.subf %10, %12 : vector<32x192xf32>
    %cst_11 = arith.constant 5.000000e-01 : f32
    %14 = vector.broadcast %cst_11 : f32 to vector<32x192xf32>
    %15 = arith.mulf %13, %14 : vector<32x192xf32>
    %16 = arith.addf %11, %15 : vector<32x192xf32>
    %cst_12 = arith.constant 1.000000e+00 : f32
    %17 = vector.broadcast %cst_12 : f32 to vector<32x192xf32>
    %18 = arith.cmpf oge, %16, %17 : vector<32x192xf32>
    %cst_13 = arith.constant 0.000000e+00 : f32
    %19 = vector.broadcast %cst_13 : f32 to vector<32x192xf32>
    %20 = arith.select %18, %19, %16 : vector<32x192xi1>, vector<32x192xf32>
    %c0_14 = arith.constant 0 : index
    %c0_15 = arith.constant 0 : index
    %21 = vector.load %arg9[%c0_14, %c0_15] : memref<32x192xf32, #tpu.memory_space<vmem>>, vector<32x192xf32>
    tpu.vector_store %arg9[%c0_14, %c0_15], %20 {strides = array<i32>} : memref<32x192xf32, #tpu.memory_space<vmem>>, vector<32x192xf32>,
    %22 = arith.extui %18 : vector<32x192xi1> to vector<32x192xi32>
    %23 = arith.sitofp %22 : vector<32x192xi32> to vector<32x192xf32>
    %24 = arith.truncf %23 : vector<32x192xf32> to vector<32x192xbf16>
    %c0_16 = arith.constant 0 : index
    %c0_17 = arith.constant 0 : index
    %25 = vector.load %arg5[%c0_16, %c0_17] : memref<64x64xf32, #tpu.memory_space<vmem>>, vector<64x64xf32>
    %26 = vector.extract_strided_slice %24 {offsets = [0, 0], sizes = [16, 64], strides = [1, 1]} : vector<32x192xbf16> to vector<16x64xbf16>
    %27 = vector.extract_strided_slice %24 {offsets = [0, 64], sizes = [16, 64], strides = [1, 1]} : vector<32x192xbf16> to vector<16x64xbf16>
    %28 = vector.extract_strided_slice %24 {offsets = [0, 128], sizes = [16, 64], strides = [1, 1]} : vector<32x192xbf16> to vector<16x64xbf16>
    %cst_18 = arith.constant dense<0.000000e+00> : vector<64x64xf32>
    %29 = tpu.matmul %27, %28, %cst_18 {dimension_numbers = #tpu.dot_dimension_numbers<[0], [0], [1], [1], [0, 1, 1, 1], [], []>} : vector<16x64xbf16>, vector<16x64xbf16>, vector<64x64xf32> -> vector<64x64xf32>
    %30 = arith.mulf %29, %25 : vector<64x64xf32>
    %31 = arith.truncf %30 : vector<64x64xf32> to vector<64x64xbf16>
    %cst_19 = arith.constant dense<0.000000e+00> : vector<16x64xf32>
    %32 = tpu.matmul %26, %31, %cst_19 {dimension_numbers = #tpu.dot_dimension_numbers<[1], [0], [0], [1], [0, 0, 1, 1], [], []>} : vector<16x64xbf16>, vector<64x64xbf16>, vector<16x64xf32> -> vector<16x64xf32>
    %33 = vector.extract_strided_slice %24 {offsets = [16, 0], sizes = [16, 64], strides = [1, 1]} : vector<32x192xbf16> to vector<16x64xbf16>
    %34 = vector.extract_strided_slice %24 {offsets = [16, 64], sizes = [16, 64], strides = [1, 1]} : vector<32x192xbf16> to vector<16x64xbf16>
    %35 = vector.extract_strided_slice %24 {offsets = [16, 128], sizes = [16, 64], strides = [1, 1]} : vector<32x192xbf16> to vector<16x64xbf16>
    %cst_20 = arith.constant dense<0.000000e+00> : vector<64x64xf32>
    %36 = tpu.matmul %34, %35, %cst_20 {dimension_numbers = #tpu.dot_dimension_numbers<[0], [0], [1], [1], [0, 1, 1, 1], [], []>} : vector<16x64xbf16>, vector<16x64xbf16>, vector<64x64xf32> -> vector<64x64xf32>
    %37 = arith.mulf %36, %25 : vector<64x64xf32>
    %38 = arith.truncf %37 : vector<64x64xf32> to vector<64x64xbf16>
    %cst_21 = arith.constant dense<0.000000e+00> : vector<16x64xf32>
    %39 = tpu.matmul %33, %38, %cst_21 {dimension_numbers = #tpu.dot_dimension_numbers<[1], [0], [0], [1], [0, 0, 1, 1], [], []>} : vector<16x64xbf16>, vector<64x64xbf16>, vector<16x64xf32> -> vector<16x64xf32>
    %40 = tpu.concatenate %32, %39 in 0 : vector<16x64xf32>, vector<16x64xf32> -> vector<32x64xf32>
    %cst_22 = arith.constant 1.250000e-01 : f32
    %41 = vector.broadcast %cst_22 : f32 to vector<32x64xf32>
    %42 = arith.mulf %40, %41 : vector<32x64xf32>
    %c0_23 = arith.constant 0 : index
    %c0_24 = arith.constant 0 : index
    %43 = vector.load %arg10[%c0_23, %c0_24] : memref<32x64xf32, #tpu.memory_space<vmem>>, vector<32x64xf32>
    %c0_25 = arith.constant 0 : index
    %c0_26 = arith.constant 0 : index
    %44 = vector.load %arg10[%c0_25, %c0_26] : memref<32x64xf32, #tpu.memory_space<vmem>>, vector<32x64xf32>
    %45 = arith.subf %42, %44 : vector<32x64xf32>
    %cst_27 = arith.constant 5.000000e-01 : f32
    %46 = vector.broadcast %cst_27 : f32 to vector<32x64xf32>
    %47 = arith.mulf %45, %46 : vector<32x64xf32>
    %48 = arith.addf %43, %47 : vector<32x64xf32>
    %cst_28 = arith.constant 5.000000e-01 : f32
    %49 = vector.broadcast %cst_28 : f32 to vector<32x64xf32>
    %50 = arith.cmpf oge, %48, %49 : vector<32x64xf32>
    %cst_29 = arith.constant 0.000000e+00 : f32
    %51 = vector.broadcast %cst_29 : f32 to vector<32x64xf32>
    %52 = arith.select %50, %51, %48 : vector<32x64xi1>, vector<32x64xf32>
    %c0_30 = arith.constant 0 : index
    %c0_31 = arith.constant 0 : index
    %53 = vector.load %arg10[%c0_30, %c0_31] : memref<32x64xf32, #tpu.memory_space<vmem>>, vector<32x64xf32>
    tpu.vector_store %arg10[%c0_30, %c0_31], %52 {strides = array<i32>} : memref<32x64xf32, #tpu.memory_space<vmem>>, vector<32x64xf32>,
    %54 = arith.extui %50 : vector<32x64xi1> to vector<32x64xi32>
    %55 = arith.sitofp %54 : vector<32x64xi32> to vector<32x64xf32>
    %56 = arith.truncf %55 : vector<32x64xf32> to vector<32x64xbf16>
    %c0_32 = arith.constant 0 : index
    %c0_33 = arith.constant 0 : index
    %57 = vector.load %arg6[%c0_32, %c0_33] : memref<64x64xbf16, #tpu.memory_space<vmem>>, vector<64x64xbf16>
    %cst_34 = arith.constant dense<0.000000e+00> : vector<32x64xf32>
    %58 = tpu.matmul %56, %57, %cst_34 {dimension_numbers = #tpu.dot_dimension_numbers<[1], [0], [0], [1], [0, 0, 1, 1], [], []>} : vector<32x64xbf16>, vector<64x64xbf16>, vector<32x64xf32> -> vector<32x64xf32>
    %c0_35 = arith.constant 0 : index
    %c0_36 = arith.constant 0 : index
    %59 = vector.load %arg7[%c0_35, %c0_36] : memref<1x64xf32, #tpu.memory_space<vmem>>, vector<1x64xf32>
    %60 = vector.broadcast %59 : vector<1x64xf32> to vector<32x64xf32>
    %61 = arith.addf %58, %60 : vector<32x64xf32>
    %c0_37 = arith.constant 0 : index
    %c0_38 = arith.constant 0 : index
    %62 = vector.load %arg11[%c0_37, %c0_38] : memref<32x64xf32, #tpu.memory_space<vmem>>, vector<32x64xf32>
    %c0_39 = arith.constant 0 : index
    %c0_40 = arith.constant 0 : index
    %63 = vector.load %arg11[%c0_39, %c0_40] : memref<32x64xf32, #tpu.memory_space<vmem>>, vector<32x64xf32>
    %64 = arith.subf %61, %63 : vector<32x64xf32>
    %cst_41 = arith.constant 5.000000e-01 : f32
    %65 = vector.broadcast %cst_41 : f32 to vector<32x64xf32>
    %66 = arith.mulf %64, %65 : vector<32x64xf32>
    %67 = arith.addf %62, %66 : vector<32x64xf32>
    %cst_42 = arith.constant 1.000000e+00 : f32
    %68 = vector.broadcast %cst_42 : f32 to vector<32x64xf32>
    %69 = arith.cmpf oge, %67, %68 : vector<32x64xf32>
    %cst_43 = arith.constant 0.000000e+00 : f32
    %70 = vector.broadcast %cst_43 : f32 to vector<32x64xf32>
    %71 = arith.select %69, %70, %67 : vector<32x64xi1>, vector<32x64xf32>
    %c0_44 = arith.constant 0 : index
    %c0_45 = arith.constant 0 : index
    %72 = vector.load %arg11[%c0_44, %c0_45] : memref<32x64xf32, #tpu.memory_space<vmem>>, vector<32x64xf32>
    tpu.vector_store %arg11[%c0_44, %c0_45], %71 {strides = array<i32>} : memref<32x64xf32, #tpu.memory_space<vmem>>, vector<32x64xf32>,
    %73 = arith.extui %69 : vector<32x64xi1> to vector<32x64xi32>
    %74 = arith.sitofp %73 : vector<32x64xi32> to vector<32x64xf32>
    %75 = arith.truncf %74 : vector<32x64xf32> to vector<32x64xbf16>
    %c0_46 = arith.constant 0 : index
    %c0_47 = arith.constant 0 : index
    %c0_48 = arith.constant 0 : index
    %76 = vector.load %arg8[%c0_46, %c0_47, %c0_48] : memref<1x32x64xbf16, #tpu.memory_space<vmem>>, vector<1x32x64xbf16>
    %77 = vector.shape_cast %76 : vector<1x32x64xbf16> to vector<32x64xbf16>
    %78 = vector.shape_cast %75 : vector<32x64xbf16> to vector<1x32x64xbf16>
    tpu.vector_store %arg8[%c0_46, %c0_47, %c0_48], %78 {strides = array<i32>} : memref<1x32x64xbf16, #tpu.memory_space<vmem>>, vector<1x32x64xbf16>,
    return
  }
  func.func @transform_0(%arg0: i32, %arg1: i32) -> (i32, i32, i32) {
    %c0_i32 = arith.constant 0 : i32
    %c0_i32_0 = arith.constant 0 : i32
    return %arg1, %arg0, %c0_i32 : i32, i32, i32
  }
  func.func @transform_1(%arg0: i32, %arg1: i32) -> (i32, i32) {
    %c0_i32 = arith.constant 0 : i32
    %c0_i32_0 = arith.constant 0 : i32
    %c0_i32_1 = arith.constant 0 : i32
    return %c0_i32, %c0_i32_0 : i32, i32
  }
  func.func @transform_2(%arg0: i32, %arg1: i32) -> (i32, i32) {
    %c0_i32 = arith.constant 0 : i32
    %c0_i32_0 = arith.constant 0 : i32
    %c0_i32_1 = arith.constant 0 : i32
    return %c0_i32, %c0_i32_0 : i32, i32
  }
  func.func @transform_3(%arg0: i32, %arg1: i32) -> (i32, i32) {
    %c0_i32 = arith.constant 0 : i32
    %c0_i32_0 = arith.constant 0 : i32
    %c0_i32_1 = arith.constant 0 : i32
    return %c0_i32, %c0_i32_0 : i32, i32
  }
  func.func @transform_4(%arg0: i32, %arg1: i32) -> (i32, i32) {
    %c0_i32 = arith.constant 0 : i32
    %c0_i32_0 = arith.constant 0 : i32
    %c0_i32_1 = arith.constant 0 : i32
    return %c0_i32, %c0_i32_0 : i32, i32
  }
  func.func @transform_5(%arg0: i32, %arg1: i32) -> (i32, i32) {
    %c0_i32 = arith.constant 0 : i32
    %c0_i32_0 = arith.constant 0 : i32
    %c0_i32_1 = arith.constant 0 : i32
    return %c0_i32, %c0_i32_0 : i32, i32
  }
  func.func @transform_6(%arg0: i32, %arg1: i32) -> (i32, i32, i32) {
    %c0_i32 = arith.constant 0 : i32
    %c0_i32_0 = arith.constant 0 : i32
    return %arg1, %arg0, %c0_i32 : i32, i32, i32
  }
}

</mosaic_0001>

<bundles_post_ra>
// kernel: tpu_custom_call.1
= control target key start
LH: loop header
LB: loop body
LE: loop exit
PB: predicated region body
PF: predicated region fallthrough
CT: control target
= control target key end

     0   :  { %s2166_s0 = inlined_call_operand.hbm [shape: f32[2,32,64], index: 0, kind: input, shape index: {}]   ;;  %s2167_s1 = inlined_call_operand.hbm [shape: bf16[64,192], index: 1, kind: input, shape index: {}]   ;;  %s2168_s2 = inlined_call_operand.vmem [shape: f32[1,192], index: 2, kind: input, shape index: {}]   ;;  %s2169_s3 = inlined_call_operand.hbm [shape: f32[64,64], index: 3, kind: input, shape index: {}]   ;;  %s2170_s4 = inlined_call_operand.hbm [shape: bf16[64,64], index: 4, kind: input, shape index: {}]   ;;  %s2171_s5 = inlined_call_operand.vmem [shape: f32[1,64], index: 5, kind: input, shape index: {}]   ;;  %s2172_s6 = inlined_call_operand.hbm [shape: bf16[2,32,64], index: 6, kind: output, shape index: {}]  }
   0x1   :  { %2180 = sst [smem:[#allocation20_spill]] %s2172_s6 }
   0x2   :  { %11 = vsyncpa [#allocation6], 0 }
   0x3   :  { %13 = vsyncpa [#allocation6 + $0x1], 0 }
   0x4   :  { %14 = vsyncpa [#allocation9], 0 }
   0x5   :  { %15 = vsyncpa [#allocation12], 0 }
   0x6   :  { %16 = vsyncpa [#allocation7], 0 }
   0x7   :  { %18 = vsyncpa [#allocation7 + $0x1], 0  ;;  %s1736_s21 = smov 0   ;;  %s1738_s22 = smov 0  }
   0x8   :  { %s1740_s23 = smov 0   ;;  %s1742_s24 = smov 0  }
   0x9   :  { %s1744_s25 = smov 0   ;;  %s1746_s26 = smov 0  }
   0xa LB: > { %2181 = sst [smem:[#allocation18_spill]] %s1663_s21  ;;  %s1198_s27 = sadd.s32 4294967295, %s1683_s26   ;;  %s1683_s26 = sphi %s1746_s26, %s24_s26   ;;  %s1679_s25 = sphi %s1744_s25, %s2207_s25   ;;  %s1675_s24 = sphi %s1742_s24, %s2206_s24   ;;  %s1671_s23 = sphi %s1740_s23, %s2205_s23   ;;  %s1667_s22 = sphi %s1738_s22, %s2204_s22   ;;  %s1663_s21 = sphi %s1736_s21, %s2203_s21  }
   0xb   : > { %s1199_s28 = sadd.s32 4294967294, %s1683_s26   ;;  %p58_p0 = scmp.ne.s32.totalorder %s1667_s22, %s1663_s21 }
   0xc   : > { %p1770_p1 = scmp.eq.s32.totalorder %s1198_s27, 0  ;;  %p1774_p2 = scmp.eq.s32.totalorder %s1198_s27, 1 }
   0xd   : > { %p195_p3 = scmp.eq.s32.totalorder %s1199_s28, 1  ;;  %p1200_p5 = scmp.ge.s32.totalorder %s1683_s26, 1 }
   0xe   : > { %s2182_s29 = scalar_select %p1770_p1, 1, 0 }
   0xf   : > { %s2183_s30 = scalar_select %p1774_p2, 1, 0 }
  0x10   : > { %p1780_p4 = por %p1770_p1, %p58_p0  ;;  %p1785_p6 = por %p195_p3, %p58_p0 }
  0x11   : > { %p202_p7 = scmp.lt.s32.totalorder %s1683_s26, 3  ;;  %s1685_s10 = smov [#allocation8]  }
  0x12   : > { %s2184_s7 = scalar_select %p1780_p4, 1, 0 }
  0x13   : > { %s2185_s8 = scalar_select %p1785_p6, 1, 0 }
  0x14   : > { %p1790_p8 = pnand %p1200_p5, %p202_p7  ;;  %s214_s11 = sshll.u32 %s1685_s10, 4  ;;  %s1794_s11 = int_to_ptr.vmem [resolvable:$true] %s214_s11 }
  0x15   : > { %2186 = sst [smem:[#allocation19_spill]] %s2185_s8  ;;  %s1686_s13 = smov [#allocation10]  }
  0x16   : > { %s2187_s9 = scalar_select %p1790_p8, 1, 0 }
  0x17   : > { %p1375_p9 = pneg %p1790_p8  ;;  %s230_s14 = sshll.u32 %s1686_s13, 4  ;;  %s1805_s14 = int_to_ptr.vmem [resolvable:$true] %s230_s14 }
  0x18   : > { %s1687_s15 = smov [#allocation11]   ;;  %s1479_s19 = scalar_lea.hbm %s2167_s1, 1024 }
  0x19   : > { %p1801_p11 = pnand %p1375_p9, %p1770_p1  ;;  %s1807_s16 = sshll.u32 %s1687_s15, 4  ;;  %s244_s16 = int_to_ptr.vmem [resolvable:$true] %s1807_s16 }
  0x1a   : > { %p1480_p12 = scmp.ne.s32.totalorder %s2167_s1, %s1479_s19  ;;  %p1486_p5 = scmp.lt.u32.totalorder %s1479_s19, %s2167_s1 }
  0x1b   : > { %p1817_p13 = pneg %p1801_p11 }
  0x1d   : > { %p1482_p0 = pnand %p1817_p13, %p1480_p12 }
  0x1f   : > { %p1483_p3 = pneg %p1482_p0 }
  0x21   : > { %p1488_p7 = pnand %p1486_p5, %p1483_p3 }
  0x23   : > { %1491 = shalt.err (!%p1488_p7)
}
  0x24   : > { %s1492_s15 = scalar_lea.vmem %s1794_s11, 1024  ;;  %p1500_p1 = scmp.lt.s32.totalorder %s1794_s11, %s1794_s11 }
  0x25   : > { %p1493_p9 = scmp.ne.s32.totalorder %s1794_s11, %s1492_s15  ;;  %p1501_p4 = scmp.lt.s32.totalorder %s1492_s15, %s1492_s15 }
  0x27   : > { %p1495_p10 = pnand %p1493_p9, %p1817_p13  ;;  %p1502_p12 = por %p1501_p4, %p1500_p1 }
  0x29   : > { %p1496_p6 = pneg %p1495_p10 }
  0x2b   : > { %p1503_p0 = pnand %p1502_p12, %p1496_p6 }
  0x2d   : > { %1506 = shalt.err (!%p1503_p0)
}
  0x2e   : > { %s1688_s17 = smov 128   ;;  %s1689_s18 = smov 8  }
  0x2f   : > { %1378 = dma.hbm_to_vmem [thread:$0]  (!%p1801_p11), %s2167_s1, 1024, %s1794_s11, [#allocation9], %s1688_s17, %s1688_s17, %s1689_s18  }
  0x30   : > { %s1507_s13 = scalar_lea.hbm %s2169_s3, 1024 }
  0x31   : > { %p1508_p1 = scmp.ne.s32.totalorder %s2169_s3, %s1507_s13  ;;  %p1514_p10 = scmp.lt.u32.totalorder %s1507_s13, %s2169_s3 }
  0x33   : > { %p1510_p4 = pnand %p1508_p1, %p1817_p13 }
  0x35   : > { %p1511_p6 = pneg %p1510_p4 }
  0x37   : > { %p1516_p3 = pnand %p1514_p10, %p1511_p6 }
  0x39   : > { %1519 = shalt.err (!%p1516_p3)
}
  0x3a   : > { %s1520_s11 = scalar_lea.vmem %s1805_s14, 1024  ;;  %p1528_p12 = scmp.lt.s32.totalorder %s1805_s14, %s1805_s14 }
  0x3b   : > { %p1521_p5 = scmp.ne.s32.totalorder %s1805_s14, %s1520_s11  ;;  %p1529_p0 = scmp.lt.s32.totalorder %s1520_s11, %s1520_s11 }
  0x3d   : > { %p1523_p7 = pnand %p1521_p5, %p1817_p13  ;;  %p1530_p1 = por %p1529_p0, %p1528_p12 }
  0x3f   : > { %p1524_p9 = pneg %p1523_p7 }
  0x41   : > { %p1531_p4 = pnand %p1530_p1, %p1524_p9 }
  0x43   : > { %1534 = shalt.err (!%p1531_p4)
}
  0x44   : > { %1381 = dma.hbm_to_vmem [thread:$0]  (!%p1801_p11), %s2169_s3, 1024, %s1805_s14, [#allocation9], %s1688_s17, %s1688_s17, %s1689_s18  }
  0x45   : > { %s1535_s20 = scalar_lea.hbm %s2170_s4, 512 }
  0x46   : > { %p1536_p6 = scmp.ne.s32.totalorder %s2170_s4, %s1535_s20  ;;  %p1542_p5 = scmp.lt.u32.totalorder %s1535_s20, %s2170_s4 }
  0x48   : > { %p1538_p10 = pnand %p1536_p6, %p1817_p13 }
  0x4a   : > { %p1539_p3 = pneg %p1538_p10 }
  0x4c   : > { %p1544_p7 = pnand %p1542_p5, %p1539_p3 }
  0x4e   : > { %1547 = shalt.err (!%p1544_p7)
}
  0x4f   : > { %s1548_s11 = scalar_lea.vmem %s244_s16, 512  ;;  %p1556_p1 = scmp.lt.s32.totalorder %s244_s16, %s244_s16 }
  0x50   : > { %p1549_p9 = scmp.ne.s32.totalorder %s244_s16, %s1548_s11  ;;  %p1557_p4 = scmp.lt.s32.totalorder %s1548_s11, %s1548_s11 }
  0x52   : > { %p1551_p12 = pnand %p1549_p9, %p1817_p13  ;;  %p1558_p8 = por %p1557_p4, %p1556_p1 }
  0x54   : > { %p1552_p0 = pneg %p1551_p12 }
  0x56   : > { %p1559_p2 = pnand %p1558_p8, %p1552_p0 }
  0x58   : > { %1562 = shalt.err (!%p1559_p2)
}
  0x59   : > { %s1690_s14 = smov 64   ;;  %s1691_s28 = smov 4  }
  0x5a   : > { %1384 = dma.hbm_to_vmem [thread:$0]  (!%p1801_p11), %s2170_s4, 512, %s244_s16, [#allocation12], %s1690_s14, %s1690_s14, %s1691_s28  }
  0x5b   : > { %s45_s8 = sadd.s32 1, %s1671_s23  ;;  %s33_s19 = sadd.s32 1, %s1679_s25 }
  0x5c   : > { %p52_p2 = scmp.ne.s32.totalorder %s1671_s23, %s1667_s22  ;;  %p34_p8 = scmp.ge.s32.totalorder %s33_s19, 2 }
  0x5d   : > { %p53_p13 = scmp.eq.s32.totalorder %s1683_s26, 0  ;;  %p2190_p6 = scmp.ne.s32.totalorder %s2183_s30, 0 }
  0x5e   : > { %p1396_p3 = scmp.lt.s32.totalorder %s1683_s26, 2  ;;  %s2209_s19 = smov (%p34_p8, %s33_s19), 0 }
  0x5f   : > { %p1893_p10 = por %p2190_p6, %p52_p2  ;;  %p54_p5 = por %p53_p13, %p52_p2 }
  0x60   : > { %s260_s12 = sand.u32 1, %s1671_s23   ;;  %s40_s27 = ssub.s32 %s1679_s25, %s2209_s19 }
  0x61   : > { %p43_p7 = scmp.eq.s32.totalorder %s40_s27, 0  ;;  %s1205_s16 = sshll.u32 %s260_s12, 5 }
  0x62   : > { %s1271_s10 = sshll.u32 %s1679_s25, 9  ;;  %s264_s14 = scalar_lea.vmem [#allocation5], %s1205_s16 }
  0x63   : > { %s1905_s13 = scalar_select %p43_p7, %s1671_s23, %s45_s8  }
  0x64   : > { %s1910_s30 = scalar_lea.hbm %s2166_s0, %s1271_s10  ;;  %s273_s28 = sshll.u32 %s264_s14, 4  ;;  %s1912_s28 = int_to_ptr.vmem [resolvable:$true] %s273_s28 }
  0x65   : > { %p1916_p11 = pnand %p1396_p3, %p54_p5  ;;  %s1920_s21 = scalar_lea.sflag [#allocation6], %s260_s12 }
  0x66   : > { %s1563_s8 = scalar_lea.hbm %s1910_s30, 512  ;;  %s1568_s10 = scalar_lea.hbm %s2166_s0, 1024 }
  0x67   : > { %p1564_p9 = scmp.ne.s32.totalorder %s1910_s30, %s1563_s8  ;;  %p1565_p12 = pneg %p1916_p11 }
  0x68   : > { %p1569_p4 = scmp.lt.u32.totalorder %s1910_s30, %s2166_s0  ;;  %p1570_p2 = scmp.lt.u32.totalorder %s1568_s10, %s1563_s8 }
  0x69   : > { %p1566_p0 = pnand %p1565_p12, %p1564_p9  ;;  %p1572_p13 = scmp.lt.u32.totalorder %s1563_s8, %s1910_s30 }
  0x6a   : > { %p1571_p8 = por %p1570_p2, %p1569_p4 }
  0x6b   : > { %p1567_p1 = pneg %p1566_p0 }
  0x6c   : > { %p1573_p6 = por %p1572_p13, %p1571_p8 }
  0x6e   : > { %p1574_p3 = pnand %p1573_p6, %p1567_p1 }
  0x70   : > { %1577 = shalt.err (!%p1574_p3)
}
  0x71   : > { %s1578_s12 = scalar_lea.vmem %s1912_s28, 512  ;;  %s1692_s14 = smov [#allocation5]  }
  0x72   : > { %p1579_p5 = scmp.ne.s32.totalorder %s1912_s28, %s1578_s12  ;;  %s1583_s27 = sshll.u32 %s1692_s14, 4  ;;  %s1584_s27 = int_to_ptr.vmem [resolvable:$false] %s1583_s27 }
  0x73   : > { %s1585_s16 = scalar_lea.vmem %s1584_s27, 1024  ;;  %p1586_p0 = scmp.lt.s32.totalorder %s1912_s28, %s1584_s27 }
  0x74   : > { %p1581_p7 = pnand %p1579_p5, %p1565_p12  ;;  %p1587_p4 = scmp.lt.s32.totalorder %s1585_s16, %s1578_s12 }
  0x76   : > { %p1582_p9 = pneg %p1581_p7  ;;  %p1588_p2 = por %p1587_p4, %p1586_p0 }
  0x78   : > { %p1589_p8 = pnand %p1588_p2, %p1582_p9 }
  0x7a   : > { %1592 = shalt.err (!%p1589_p8)
}
  0x7b   : > { %1388 = dma.hbm_to_vmem [thread:$0]  (!%p1916_p11), %s1910_s30, 512, %s1912_s28, %s1920_s21, %s1688_s17, %s1688_s17, %s1689_s18  }
  0x7c   : > { %p2193_p12 = scmp.ne.s32.totalorder %s2187_s9, 0 }
  0x7d   : > { %s1954_s8 = sand.u32 (!%p2193_p12), 1, %s1667_s22   ;;  %p2194_p1 = scmp.ne.s32.totalorder (!%p2193_p12), %s2184_s7, 0 }
  0x7e   : > { %285 = sbr.rel (%p2193_p12) target bundleno = 1558 (0x616), region = 44  ;;  %s1209_s10 = sshll.u32 (!%p2193_p12), %s1954_s8, 5 }
  0x7f   : > { %s288_s15 = scalar_lea.sflag (!%p2193_p12), [#allocation6], %s1954_s8  ;;  %s1958_s11 = scalar_lea.vmem (!%p2193_p12), [#allocation5], %s1209_s10 }
  0x85   : > { %1646 = dma.done.wait (%p2194_p1), %s288_s15, 512  }
  0x86   : > { %1648 = vsyncadd (%p2194_p1), %s288_s15, 4294966784  ;;  %p2195_p11 = scmp.ne.s32.totalorder %s2182_s29, 0 }
  0x88   : > { %1650 = dma.done.wait (%p2195_p11), [#allocation9], 2048  }
  0x89   : > { %1652 = vsyncadd (%p2195_p11), [#allocation9], 4294965248 }
  0x8a   : > { %1654 = dma.done.wait (%p2195_p11), [#allocation12], 512  }
  0x8b   : > { %1656 = vsyncadd (%p2195_p11), [#allocation12], 4294966784  ;;  %s1213_s9 = sshll.u32 %s1954_s8, 4  ;;  %p1214_p13 = scmp.ne.s32.totalorder %s1675_s24, 0 }
  0x8c   : > { %s1973_s17 = scalar_lea.vmem [#allocation13], %s1213_s9  ;;  %vm340_vm0 = vcmask (!%p1214_p13), 523264   ;;  %v1693_v0 = vmov (!%p1214_p13), 0.0  }
  0x8d   : > { %338 = sbr.rel (%p1214_p13) target bundleno = 149 (0x95), region = 64  ;;  %339 = vst [vmem:[#allocation2] sm:$0xff] (!%p1214_p13), %v1693_v0  ;;  %342 = vst [vmem:[#allocation2 + $0x10] sm:$0xff] (!%p1214_p13), %v1693_v0 }
  0x8e   : > { %344 = vst [vmem:[#allocation2 + $0x20] sm:$0xff] (!%p1214_p13), %v1693_v0  ;;  %346 = vst [vmem:[#allocation2 + $0x30] sm:$0xff] (!%p1214_p13), %v1693_v0 }
  0x8f   : > { %341 = vst.msk [vmem:[#allocation2 + $0x8] sm:$0xff] (!%p1214_p13), %vm340_vm0, %v1693_v0  ;;  %343 = vst.msk [vmem:[#allocation2 + $0x18] sm:$0xff] (!%p1214_p13), %vm340_vm0, %v1693_v0 }
  0x90   : > { %345 = vst.msk [vmem:[#allocation2 + $0x28] sm:$0xff] (!%p1214_p13), %vm340_vm0, %v1693_v0  ;;  %347 = vst.msk [vmem:[#allocation2 + $0x38] sm:$0xff] (!%p1214_p13), %vm340_vm0, %v1693_v0 }
  0x91   : > { %348 = vst.msk [vmem:[#allocation3] sm:$0xff] (!%p1214_p13), %vm340_vm0, %v1693_v0  ;;  %349 = vst.msk [vmem:[#allocation3 + $0x8] sm:$0xff] (!%p1214_p13), %vm340_vm0, %v1693_v0 }
  0x92   : > { %350 = vst.msk [vmem:[#allocation3 + $0x10] sm:$0xff] (!%p1214_p13), %vm340_vm0, %v1693_v0  ;;  %351 = vst.msk [vmem:[#allocation3 + $0x18] sm:$0xff] (!%p1214_p13), %vm340_vm0, %v1693_v0 }
  0x93   : > { %352 = vst.msk [vmem:[#allocation4] sm:$0xff] (!%p1214_p13), %vm340_vm0, %v1693_v0  ;;  %353 = vst.msk [vmem:[#allocation4 + $0x8] sm:$0xff] (!%p1214_p13), %vm340_vm0, %v1693_v0 }
  0x94   : > { %354 = vst.msk [vmem:[#allocation4 + $0x10] sm:$0xff] %vm340_vm0, %v1693_v0  ;;  %355 = vst.msk [vmem:[#allocation4 + $0x18] sm:$0xff] %vm340_vm0, %v1693_v0 }
  0x95 PF: > { %v1463_v1 = vld [vmem:[#allocation8 + $0x4] ss:$8 sps:$4 sm:$0xff]   ;;  %v1465_v2 = vld [vmem:[#allocation8] ss:$8 sps:$4 sm:$0xff]   ;;  %v1694_v3 = vmov 0   ;;  %vm422_vm1 = vcmask 523264   ;;  %v372_v17 = vlaneseq }
  0x96   : > { %461 = vmatprep.mubr.bf16.mxu0 %v1694_v3  ;;  %429 = vmatprep.subr.bf16.mxu0 %v1463_v1  ;;  %v1466_v4 = vld [vmem:[#allocation8 + $0x14] ss:$8 sps:$4 sm:$0xff]   ;;  %v1468_v5 = vld [vmem:[#allocation8 + $0x10] ss:$8 sps:$4 sm:$0xff]   ;;  %v1469_v6 = vld [vmem:[#allocation8 + $0x24] ss:$8 sps:$4 sm:$0xff]  }
  0x97   : > { %430 = vmatpush1.bf16.msra.mxu0 %v1465_v2  ;;  %v1471_v7 = vld [vmem:[#allocation8 + $0x20] ss:$8 sps:$4 sm:$0xff]   ;;  %v1472_v8 = vld [vmem:[#allocation8 + $0x34] ss:$8 sps:$4 sm:$0xff]   ;;  %v1474_v9 = vld [vmem:[#allocation8 + $0x30] ss:$8 sps:$4 sm:$0xff]  }
  0x98   : > { %431 = vmatprep.subr.bf16.mxu0 %v1466_v4  ;;  %v356_v10 = vld [vmem:[%s1958_s11] sm:$0xff]  ;;  %v357_v11 = vld [vmem:[%s1958_s11 + $0x8] sm:$0xff]  ;;  %v1695_v13 = vmov 0.0   ;;  %v358_v14 = vld [vmem:[%s1958_s11 + $0x10] sm:$0xff]  ;;  %v373_v18 = vshrl.u32 %v372_v17, 7  ;;  %s1697_s18 = smov 64  }
  0x99   : > { %v360_v12 = vpack.c.bf16 %v357_v11, %v356_v10  ;;  %v359_v15 = vld [vmem:[%s1958_s11 + $0x18] sm:$0xff]  ;;  %v370_v20 = vld [vmem:[%s2168_s2] sm:$0x3]  ;;  %v483_v28 = vld [vmem:[#allocation2 + $0x8] sm:$0xff]  ;;  %v1696_v55 = vmov 1.0|1.0  }
  0x9a   : > { %v361_v16 = vpack.c.bf16 %v359_v15, %v358_v14  ;;  %v374_v19 = vsub.s32 0, %v373_v18  ;;  %v378_v21 = vsub.s32 1, %v373_v18  ;;  %v482_v25 = vld [vmem:[#allocation2] sm:$0xff]  ;;  %v484_v31 = vld [vmem:[#allocation2 + $0x10] sm:$0xff]  ;;  %v485_v35 = vld [vmem:[#allocation2 + $0x18] sm:$0xff]  ;;  %vm586_vm12 = vcmask 130048  }
  0x9b   : > { %432 = vmatpush1.bf16.msra.mxu0 %v1468_v5  ;;  %v486_v57 = vld [vmem:[#allocation2 + $0x20] sm:$0xff]  ;;  %v487_v60 = vld [vmem:[#allocation2 + $0x28] sm:$0xff]  ;;  %v488_v63 = vld [vmem:[#allocation2 + $0x30] sm:$0xff]  ;;  %vm1698_vm13 = vmmov 0   ;;  %s1276_s6 = sshll.u32 %s1675_s24, 8  ;;  %s1082_s21 = sshll.u32 %s1973_s17, 4  ;;  %s2111_s21 = int_to_ptr.vmem [resolvable:$true] %s1082_s21 }
  0x9c   : > { %433 = vmatprep.subr.bf16.mxu0 %v1469_v6  ;;  %v375_v22 = vrot.slane %v370_v20, %v374_v19  ;;  %v379_v23 = vrot.slane %v370_v20, %v378_v21  ;;  %s2198_s14 = sld [smem:[#allocation20_spill]]  ;;  %s1067_s16 = scalar_lea.sflag [#allocation7], %s1954_s8 }
  0x9d   : > { %s1593_s10 = scalar_lea.vmem %s2111_s21, 256  ;;  %s1699_s15 = smov [#allocation13]  }
  0x9e   : > { %p1594_p6 = scmp.ne.s32.totalorder %s2111_s21, %s1593_s10  ;;  %s1597_s11 = sshll.u32 %s1699_s15, 4  ;;  %s1598_s11 = int_to_ptr.vmem [resolvable:$false] %s1597_s11 }
  0x9f   : > { %434 = vmatpush1.bf16.msra.mxu0 %v1471_v7  ;;  %s1599_s9 = scalar_lea.vmem %s1598_s11, 512  ;;  %p1600_p7 = scmp.lt.s32.totalorder %s2111_s21, %s1598_s11 }
  0xa0   : > { %435 = vmatprep.subr.bf16.mxu0 %v1472_v8  ;;  %p1595_p3 = pnand %p1594_p6, %p1893_p10  ;;  %p1601_p9 = scmp.lt.s32.totalorder %s1599_s9, %s1593_s10 }
  0xa2   : > { %s2106_s27 = scalar_lea.hbm %s2198_s14, %s1276_s6  ;;  %p1596_p5 = pneg %p1595_p3 }
  0xa3   : > { %436 = vmatpush1.bf16.msra.mxu0 %v1474_v9  ;;  %p1602_p0 = por %p1601_p9, %p1600_p7 }
  0xa4   : > { %1335 = vmatprep.subr.bf16.mxu0 %v1695_v13 }
  0xa5   : > { %p1603_p4 = pnand %p1602_p0, %p1596_p5 }
  0xa6   : > { %1223 = vmatmul.mubr.msk.bf16.vlgmr.msra.gmra.mrb[0].mxu0 %vm422_vm1, %v360_v12 }
  0xa7   : > { %471 = vmatprep.mubr.bf16.mxu0 %v1694_v3  ;;  %v489_v3 = vld [vmem:[#allocation2 + $0x38] sm:$0xff] }
  0xae   : > { %1224 = vmatmul.mubr.msk.bf16.gmra.mrb[4].mxu0 %vm422_vm1, %v361_v16 }
  0xaf   : > { %1343 = vmatprep.mubr.msk.bf16.mxu0 %vm1698_vm13, %v1695_v13 }
 0x179   : > { %v463_v24 = vpop.f32.mrb[0].mxu0 }
 0x17a   : > { %v464_v26 = vadd.f32 %v463_v24, %v375_v22  ;;  %v465_v27 = vpop.f32.mrb[1].mxu0 }
 0x17b   : > { %v466_v29 = vadd.f32 %v465_v27, %v379_v23  ;;  %v467_v30 = vpop.f32.mrb[2].mxu0 }
 0x17c   : > { %v490_v32 = vsub.f32 %v464_v26, %v482_v25  ;;  %v468_v33 = vadd.f32 %v467_v30, %v375_v22  ;;  %v469_v34 = vpop.f32.mrb[3].mxu0 }
 0x17d   : > { %v491_v36 = vsub.f32 %v466_v29, %v483_v28  ;;  %v470_v37 = vadd.f32 %v469_v34, %v379_v23  ;;  %v2031_v34 = vld [vmem:[#allocation10] sm:$0xff] }
 0x17e   : > { %v498_v38 = vmul.f32 0.5, %v490_v32  ;;  %v492_v39 = vsub.f32 %v468_v33, %v484_v31  ;;  %v2029_v33 = vld [vmem:[#allocation10 + $0x18] sm:$0xff] }
 0x17f   : > { %v499_v40 = vmul.f32 0.5, %v491_v36  ;;  %v493_v41 = vsub.f32 %v470_v37, %v485_v35  ;;  %v2033_v36 = vld [vmem:[#allocation10 + $0x8] sm:$0xff] }
 0x180   : > { %v506_v42 = vadd.f32 %v498_v38, %v482_v25  ;;  %v500_v43 = vmul.f32 0.5, %v492_v39 }
 0x181   : > { %v501_v44 = vmul.f32 0.5, %v493_v41  ;;  %v507_v45 = vadd.f32 %v499_v40, %v483_v28  ;;  %v473_v56 = vpop.f32.mrb[4].mxu0 }
 0x182   : > { %v508_v46 = vadd.f32 %v500_v43, %v484_v31  ;;  %vm514_vm2 = vcmp.ge.f32.partialorder %v506_v42, 1.0  ;;  %v474_v58 = vadd.f32 %v473_v56, %v375_v22  ;;  %v475_v59 = vpop.f32.mrb[5].mxu0  ;;  %v2027_v31 = vld [vmem:[#allocation10 + $0x10] sm:$0xff] }
 0x183   : > { %v509_v47 = vadd.f32 %v501_v44, %v485_v35  ;;  %vm515_vm3 = vcmp.ge.f32.partialorder %v507_v45, 1.0  ;;  %v522_v48 = vsel %vm514_vm2, 0.0, %v506_v42  ;;  %v1225_v51 = vsel %vm514_vm2, 1.0, %v1695_v13  ;;  %v477_v62 = vpop.f32.mrb[6].mxu0 }
 0x184   : > { %v523_v49 = vsel %vm515_vm3, 0.0, %v507_v45  ;;  %vm516_vm4 = vcmp.ge.f32.partialorder %v508_v46, 1.0  ;;  %530 = vst [vmem:[#allocation2] sm:$0xff] %v522_v48  ;;  %v476_v61 = vadd.f32 %v475_v59, %v379_v23  ;;  %v494_v0 = vsub.f32 %v474_v58, %v486_v57  ;;  %v479_v2 = vpop.f32.mrb[7].mxu0  ;;  %v2039_v45 = vld [vmem:[#allocation10 + $0x30] sm:$0xff]  ;;  %v2043_v48 = vld [vmem:[#allocation10 + $0x20] sm:$0xff] }
 0x185   : > { %vm517_vm5 = vcmp.ge.f32.partialorder %v509_v47, 1.0  ;;  %531 = vst.msk [vmem:[#allocation2 + $0x8] sm:$0xff] %vm422_vm1, %v523_v49  ;;  %v524_v50 = vsel %vm516_vm4, 0.0, %v508_v46  ;;  %v1227_v52 = vsel %vm516_vm4, 1.0, %v1695_v13  ;;  %v478_v1 = vadd.f32 %v477_v62, %v375_v22 }
 0x186   : > { %v525_v53 = vsel %vm517_vm5, 0.0, %v509_v47  ;;  %vm1233_vm6 = vmpackc.low %vm517_vm5, %vm515_vm3  ;;  %532 = vst [vmem:[#allocation2 + $0x10] sm:$0xff] %v524_v50  ;;  %v2001_v54 = vpack.c.bf16 %v1227_v52, %v1225_v51  ;;  %v495_v4 = vsub.f32 %v476_v61, %v487_v60  ;;  %v480_v5 = vadd.f32 %v479_v2, %v379_v23  ;;  %v2041_v47 = vld [vmem:[#allocation10 + $0x38] sm:$0xff]  ;;  %v2045_v50 = vld [vmem:[#allocation10 + $0x28] sm:$0xff] }
 0x187   : > { %533 = vst.msk [vmem:[#allocation2 + $0x18] sm:$0xff] %vm422_vm1, %v525_v53  ;;  %1303 = vmatprep.subr.msk.bf16.mxu1 %vm1233_vm6, %v1696_v55  ;;  %v502_v6 = vmul.f32 0.5, %v494_v0  ;;  %v496_v7 = vsub.f32 %v478_v1, %v488_v63  ;;  %v1475_v1 = vld [vmem:[#allocation11] sm:$0xff]   ;;  %vm1061_vm4 = vcmask 519168  }
 0x188   : > { %1304 = vmatpush3.bf16.msk.msra.mxu1 %vm1233_vm6, %v1696_v55  ;;  %567 = vrot.lane.b32.xlu0 %v2001_v54, %s1697_s18  ;;  %v503_v8 = vmul.f32 0.5, %v495_v4  ;;  %v497_v9 = vsub.f32 %v480_v5, %v489_v3 }
 0x189   : > { %1313 = vmatprep.subr.bf16.mxu1 %v1695_v13  ;;  %v510_v10 = vadd.f32 %v502_v6, %v486_v57  ;;  %v504_v11 = vmul.f32 0.5, %v496_v7  ;;  %v878_v6 = vld [vmem:[#allocation3 + $0x8] sm:$0xff] }
 0x18a   : > { %v505_v12 = vmul.f32 0.5, %v497_v9  ;;  %v511_v14 = vadd.f32 %v503_v8, %v487_v60 }
 0x18b   : > { %v512_v15 = vadd.f32 %v504_v11, %v488_v63  ;;  %vm518_vm7 = vcmp.ge.f32.partialorder %v510_v10, 1.0 }
 0x18c   : > { %v513_v16 = vadd.f32 %v505_v12, %v489_v3  ;;  %v1229_v17 = vsel %vm518_vm7, 1.0, %v1695_v13  ;;  %v526_v18 = vsel %vm518_vm7, 0.0, %v510_v10  ;;  %vm519_vm9 = vcmp.ge.f32.partialorder %v511_v14, 1.0 }
 0x18d   : > { %vm520_vm8 = vcmp.ge.f32.partialorder %v512_v15, 1.0  ;;  %534 = vst [vmem:[#allocation2 + $0x20] sm:$0xff] %v526_v18  ;;  %v527_v22 = vsel %vm519_vm9, 0.0, %v511_v14 }
 0x18e   : > { %v528_v19 = vsel %vm520_vm8, 0.0, %v512_v15  ;;  %v1231_v20 = vsel %vm520_vm8, 1.0, %v1695_v13  ;;  %vm521_vm10 = vcmp.ge.f32.partialorder %v513_v16, 1.0  ;;  %535 = vst.msk [vmem:[#allocation2 + $0x28] sm:$0xff] %vm422_vm1, %v527_v22 }
 0x18f   : > { %536 = vst [vmem:[#allocation2 + $0x30] sm:$0xff] %v528_v19  ;;  %v2011_v21 = vpack.c.bf16 %v1231_v20, %v1229_v17  ;;  %v529_v23 = vsel %vm521_vm10, 0.0, %v513_v16  ;;  %vm2017_vm11 = vmpackc.low %vm521_vm10, %vm519_vm9 }
 0x190   : > { %537 = vst.msk [vmem:[#allocation2 + $0x38] sm:$0xff] %vm422_vm1, %v529_v23 }
 0x191   : > { %721 = vrot.lane.b32.xlu1 %v2011_v21, %s1697_s18 }
 0x1fa   : > { %v568_v25 = vpop.permute.xlu0 %567 }
 0x1fb   : > { %570 = vxpose.xlu0.c.b16.start.end [1/1] (short) (narrow) %v568_v25, 64 }
 0x203   : > { %v722_v28 = vpop.permute.xlu1 %721 }
 0x204   : > { %724 = vxpose.xlu1.c.b16.start.end [1/1] (short) (narrow) %v722_v28, 64 }
 0x261   : > { %v578_v26 = vpop.trf.xlu0 }
 0x262   : > { %1305 = vmatprep.mubr.msk.bf16.mxu1 %vm586_vm12, %v578_v26 }
 0x265   : > { %v579_v27 = vpop.trf.xlu0 }
 0x266   : > { %1306 = vmatmul.mubr.msk.bf16.vlgmr.msra.gmra.mrb[0].mxu1 %vm586_vm12, %v579_v27 }
 0x269   : > { %v580_v29 = vpop.trf.xlu0 }
 0x26a   : > { %1309 = vmatprep.mubr.msk.bf16.mxu1 %vm586_vm12, %v580_v29  ;;  %v732_v61 = vpop.trf.xlu1 }
 0x26d   : > { %v581_v30 = vpop.trf.xlu0 }
 0x26e   : > { %1310 = vmatmul.mubr.msk.bf16.gmra.mrb[4].mxu1 %vm586_vm12, %v581_v30  ;;  %v733_v62 = vpop.trf.xlu1 }
 0x26f   : > { %1321 = vmatprep.mubr.msk.bf16.mxu1 %vm1698_vm13, %v1695_v13 }
 0x272   : > { %v734_v63 = vpop.trf.xlu1 }
 0x276   : > { %v735_v0 = vpop.trf.xlu1 }
 0x339   : > { %v1307_v32 = vpop.f32.mrb[0].mxu1 }
 0x33a   : > { %v633_v35 = vpop.f32.mrb[1].mxu1  ;;  %v666_v38 = vmul.f32 %v1307_v32, %v2027_v31 }
 0x33b   : > { %v1308_v37 = vpop.f32.mrb[2].mxu1  ;;  %v664_v41 = vmul.f32 %v633_v35, %v2031_v34 }
 0x33c   : > { %v667_v39 = vmul.f32 %v1308_v37, %v2029_v33  ;;  %v636_v40 = vpop.f32.mrb[3].mxu1 }
 0x33d   : > { %v665_v42 = vmul.f32 %v636_v40, %v2033_v36 }
 0x33e   : > { %v673_v43 = vpack.c.bf16 %v667_v39, %v666_v38 }
 0x33f   : > { %v672_v44 = vpack.c.bf16 %v665_v42, %v664_v41  ;;  %v1476_v41 = vld [vmem:[#allocation11 + $0x8] sm:$0xff]   ;;  %v1477_v42 = vld [vmem:[#allocation11 + $0x10] sm:$0xff]  }
 0x341   : > { %v1311_v46 = vpop.f32.mrb[4].mxu1  ;;  %1314 = vmatpush3.bf16.msra.mxu1 %v672_v44 }
 0x342   : > { %v649_v49 = vpop.f32.mrb[5].mxu1  ;;  %1315 = vmatprep.subr.bf16.mxu1 %v1695_v13  ;;  %v670_v52 = vmul.f32 %v1311_v46, %v2039_v45 }
 0x343   : > { %v1312_v51 = vpop.f32.mrb[6].mxu1  ;;  %v668_v57 = vmul.f32 %v649_v49, %v2043_v48  ;;  %v880_v49 = vld [vmem:[#allocation3 + $0x18] sm:$0xff] }
 0x344   : > { %v671_v53 = vmul.f32 %v1312_v51, %v2041_v47  ;;  %v652_v56 = vpop.f32.mrb[7].mxu1 }
 0x345   : > { %v669_v58 = vmul.f32 %v652_v56, %v2045_v50  ;;  %1316 = vmatpush3.bf16.msra.mxu1 %v673_v43  ;;  %v1478_v43 = vld [vmem:[#allocation11 + $0x18] sm:$0xff]  }
 0x346   : > { %v675_v59 = vpack.c.bf16 %v671_v53, %v670_v52  ;;  %1317 = vmatprep.subr.bf16.mxu1 %v1695_v13 }
 0x347   : > { %v674_v60 = vpack.c.bf16 %v669_v58, %v668_v57 }
 0x349   : > { %1318 = vmatpush3.bf16.msra.mxu1 %v674_v60 }
 0x34a   : > { %1319 = vmatprep.subr.bf16.mxu1 %v1695_v13 }
 0x34d   : > { %1320 = vmatpush3.bf16.msra.mxu1 %v675_v59 }
 0x34e   : > { %1325 = vmatprep.subr.msk.bf16.mxu1 %vm2017_vm11, %v1696_v55 }
 0x350   : > { %1322 = vmatmul.mubr.msk.bf16.vlgmr.msra.gmra.mrb[8].mxu1 %vm422_vm1, %v2001_v54  ;;  %v877_v54 = vld [vmem:[#allocation3] sm:$0xff] }
 0x351   : > { %1326 = vmatpush3.bf16.msk.msra.mxu1 %vm2017_vm11, %v1696_v55  ;;  %1327 = vmatprep.mubr.msk.bf16.mxu1 %vm586_vm12, %v732_v61 }
 0x352   : > { %1347 = vmatprep.subr.bf16.mxu1 %v1475_v1 }
 0x358   : > { %1328 = vmatmul.mubr.msk.bf16.vlgmr.msra.gmra.mrb[12].mxu1 %vm586_vm12, %v733_v62 }
 0x359   : > { %1331 = vmatprep.mubr.msk.bf16.mxu1 %vm586_vm12, %v734_v63  ;;  %1348 = vmatpush3.bf16.msra.mxu1 %v1475_v1 }
 0x35a   : > { %1349 = vmatprep.subr.bf16.mxu1 %v1476_v41 }
 0x35d   : > { %1350 = vmatpush3.bf16.msra.mxu1 %v1476_v41 }
 0x35e   : > { %1351 = vmatprep.subr.bf16.mxu1 %v1477_v42 }
 0x360   : > { %1332 = vmatmul.mubr.msk.bf16.gmra.mrb[16].mxu1 %vm586_vm12, %v735_v0  ;;  %v1251_v0 = vld [vmem:[%s2171_s5] ss:$0 sm:$0xff] }
 0x361   : > { %1352 = vmatpush3.bf16.msra.mxu1 %v1477_v42 }
 0x362   : > { %1353 = vmatprep.subr.bf16.mxu1 %v1478_v43 }
 0x365   : > { %1354 = vmatpush3.bf16.msra.mxu1 %v1478_v43 }
 0x423   : > { %v713_v2 = vpop.f32.mrb[8].mxu1 }
 0x424   : > { %v873_v3 = vmul.f32 0.125, %v713_v2  ;;  %v1323_v4 = vpop.f32.mrb[9].mxu1  ;;  %v1011_v2 = vld [vmem:[#allocation4 + $0x10] sm:$0xff] }
 0x425   : > { %v716_v5 = vpop.f32.mrb[10].mxu1  ;;  %v1009_v4 = vld [vmem:[#allocation4] sm:$0xff] }
 0x426   : > { %v881_v55 = vsub.f32 %v873_v3, %v877_v54  ;;  %v874_v7 = vmul.f32 0.125, %v716_v5  ;;  %v1324_v8 = vpop.f32.mrb[11].mxu1 }
 0x428   : > { %v885_v9 = vmul.f32 0.5, %v881_v55  ;;  %v882_v10 = vsub.f32 %v874_v7, %v878_v6  ;;  %v1012_v55 = vld [vmem:[#allocation4 + $0x18] sm:$0xff] }
 0x42a   : > { %v889_v11 = vadd.f32 %v885_v9, %v877_v54  ;;  %v886_v12 = vmul.f32 0.5, %v882_v10  ;;  %v1010_v10 = vld [vmem:[#allocation4 + $0x8] sm:$0xff] }
 0x42b   : > { %v1329_v14 = vpop.f32.mrb[12].mxu1 }
 0x42c   : > { %vm893_vm14 = vcmp.ge.f32.partialorder %v889_v11, 0.5  ;;  %v890_v15 = vadd.f32 %v886_v12, %v878_v6  ;;  %v786_v16 = vpop.f32.mrb[13].mxu1  ;;  %v819_v20 = vmul.f32 %v1329_v14, %v2027_v31 }
 0x42d   : > { %v897_v17 = vsel %vm893_vm14, 0.0, %v889_v11  ;;  %v1330_v18 = vpop.f32.mrb[14].mxu1  ;;  %v1247_v19 = vsel %vm893_vm14, 1.0, %v1695_v13  ;;  %v817_v26 = vmul.f32 %v786_v16, %v2031_v34 }
 0x42e   : > { %901 = vst.msk [vmem:[#allocation3] sm:$0xff] %vm422_vm1, %v897_v17  ;;  %vm894_vm15 = vcmp.ge.f32.partialorder %v890_v15, 0.5  ;;  %v820_v22 = vmul.f32 %v1330_v18, %v2029_v33  ;;  %v789_v23 = vpop.f32.mrb[15].mxu1 }
 0x42f   : > { %v898_v24 = vsel %vm894_vm15, 0.0, %v890_v15  ;;  %v1248_v25 = vsel %vm894_vm15, 1.0, %v1695_v13  ;;  %v818_v27 = vmul.f32 %v789_v23, %v2033_v36 }
 0x430   : > { %902 = vst.msk [vmem:[#allocation3 + $0x8] sm:$0xff] %vm422_vm1, %v898_v24  ;;  %v826_v28 = vpack.c.bf16 %v820_v22, %v819_v20  ;;  %v913_v29 = vpack.c.bf16 %v1248_v25, %v1247_v19 }
 0x431   : > { %v825_v30 = vpack.c.bf16 %v818_v27, %v817_v26 }
 0x432   : > { %1355 = vmatprep.mubr.msk.bf16.mxu1 %vm422_vm1, %v913_v29 }
 0x433   : > { %v1333_v32 = vpop.f32.mrb[16].mxu1  ;;  %1336 = vmatpush3.bf16.msra.mxu0 %v825_v30 }
 0x434   : > { %v802_v31 = vpop.f32.mrb[17].mxu1  ;;  %1337 = vmatprep.subr.bf16.mxu0 %v1695_v13  ;;  %v823_v35 = vmul.f32 %v1333_v32, %v2039_v45  ;;  %v879_v45 = vld [vmem:[#allocation3 + $0x10] sm:$0xff] }
 0x435   : > { %v1334_v33 = vpop.f32.mrb[18].mxu1  ;;  %v821_v36 = vmul.f32 %v802_v31, %v2043_v48 }
 0x436   : > { %v824_v37 = vmul.f32 %v1334_v33, %v2041_v47  ;;  %v805_v34 = vpop.f32.mrb[19].mxu1 }
 0x437   : > { %v822_v38 = vmul.f32 %v805_v34, %v2045_v50  ;;  %1338 = vmatpush3.bf16.msra.mxu0 %v826_v28 }
 0x438   : > { %v828_v39 = vpack.c.bf16 %v824_v37, %v823_v35  ;;  %1339 = vmatprep.subr.bf16.mxu0 %v1695_v13 }
 0x439   : > { %v827_v40 = vpack.c.bf16 %v822_v38, %v821_v36 }
 0x43b   : > { %1340 = vmatpush3.bf16.msra.mxu0 %v827_v40 }
 0x43c   : > { %1341 = vmatprep.subr.bf16.mxu0 %v1695_v13 }
 0x43f   : > { %1342 = vmatpush3.bf16.msra.mxu0 %v828_v39 }
 0x442   : > { %1344 = vmatmul.mubr.msk.bf16.vlgmr.msra.gmra.mrb[8].mxu0 %vm422_vm1, %v2011_v21 }
 0x515   : > { %v866_v44 = vpop.f32.mrb[8].mxu0 }
 0x516   : > { %v875_v46 = vmul.f32 0.125, %v866_v44  ;;  %v1345_v47 = vpop.f32.mrb[9].mxu0 }
 0x517   : > { %v869_v48 = vpop.f32.mrb[10].mxu0 }
 0x518   : > { %v883_v50 = vsub.f32 %v875_v46, %v879_v45  ;;  %v876_v51 = vmul.f32 0.125, %v869_v48  ;;  %v1346_v52 = vpop.f32.mrb[11].mxu0 }
 0x51a   : > { %v887_v53 = vmul.f32 0.5, %v883_v50  ;;  %v884_v21 = vsub.f32 %v876_v51, %v880_v49 }
 0x51c   : > { %v891_v56 = vadd.f32 %v887_v53, %v879_v45  ;;  %v888_v57 = vmul.f32 0.5, %v884_v21 }
 0x51e   : > { %vm895_vm0 = vcmp.ge.f32.partialorder %v891_v56, 0.5  ;;  %v892_v58 = vadd.f32 %v888_v57, %v880_v49 }
 0x51f   : > { %v899_v59 = vsel %vm895_vm0, 0.0, %v891_v56  ;;  %v1249_v60 = vsel %vm895_vm0, 1.0, %v1695_v13 }
 0x520   : > { %903 = vst.msk [vmem:[#allocation3 + $0x10] sm:$0xff] %vm422_vm1, %v899_v59  ;;  %vm896_vm2 = vcmp.ge.f32.partialorder %v892_v58, 0.5 }
 0x521   : > { %v900_v61 = vsel %vm896_vm2, 0.0, %v892_v58  ;;  %v1250_v62 = vsel %vm896_vm2, 1.0, %v1695_v13 }
 0x522   : > { %904 = vst.msk [vmem:[#allocation3 + $0x18] sm:$0xff] %vm422_vm1, %v900_v61  ;;  %v914_v63 = vpack.c.bf16 %v1250_v62, %v1249_v60 }
 0x524   : > { %1356 = vmatmul.mubr.msk.bf16.vlgmr.msra.gmra.mrb[20].mxu1 %vm422_vm1, %v914_v63 }
 0x5f7   : > { %v1357_v1 = vpop.f32.mrb[20].mxu1 }
 0x5f8   : > { %v1003_v54 = vadd.f32 %v1357_v1, %v1251_v0  ;;  %v994_v3 = vpop.f32.mrb[21].mxu1 }
 0x5f9   : > { %v995_v5 = vadd.f32 %v1251_v0, %v994_v3  ;;  %v1358_v6 = vpop.f32.mrb[22].mxu1 }
 0x5fa   : > { %v1015_v7 = vsub.f32 %v1003_v54, %v1011_v2  ;;  %v1006_v8 = vadd.f32 %v1358_v6, %v1251_v0  ;;  %v997_v9 = vpop.f32.mrb[23].mxu1 }
 0x5fb   : > { %v1013_v11 = vsub.f32 %v995_v5, %v1009_v4  ;;  %v998_v12 = vadd.f32 %v1251_v0, %v997_v9 }
 0x5fc   : > { %v1019_v14 = vmul.f32 0.5, %v1015_v7  ;;  %v1016_v15 = vsub.f32 %v1006_v8, %v1012_v55 }
 0x5fd   : > { %v1017_v16 = vmul.f32 0.5, %v1013_v11  ;;  %v1014_v17 = vsub.f32 %v998_v12, %v1010_v10 }
 0x5fe   : > { %v1023_v18 = vadd.f32 %v1019_v14, %v1011_v2  ;;  %v1020_v19 = vmul.f32 0.5, %v1016_v15 }
 0x5ff   : > { %v1021_v20 = vadd.f32 %v1017_v16, %v1009_v4  ;;  %v1018_v22 = vmul.f32 0.5, %v1014_v17 }
 0x600   : > { %vm1027_vm3 = vcmp.ge.f32.partialorder %v1023_v18, 1.0  ;;  %v1024_v23 = vadd.f32 %v1020_v19, %v1012_v55 }
 0x601   : > { %v1031_v24 = vsel %vm1027_vm3, 0.0, %v1023_v18  ;;  %v1260_v25 = vsel %vm1027_vm3, 1.0, %v1695_v13  ;;  %vm1025_vm5 = vcmp.ge.f32.partialorder %v1021_v20, 1.0  ;;  %v1022_v26 = vadd.f32 %v1018_v22, %v1010_v10 }
 0x602   : > { %1035 = vst.msk [vmem:[#allocation4 + $0x10] sm:$0xff] %vm422_vm1, %v1031_v24  ;;  %v1274_v27 = vpack.c.bf16 %v1260_v25, %v1260_v25  ;;  %v1029_v28 = vsel %vm1025_vm5, 0.0, %v1021_v20  ;;  %v1258_v29 = vsel %vm1025_vm5, 1.0, %v1695_v13  ;;  %vm1028_vm6 = vcmp.ge.f32.partialorder %v1024_v23, 1.0 }
 0x603   : > { %1033 = vst.msk [vmem:[#allocation4] sm:$0xff] %vm422_vm1, %v1029_v28  ;;  %v1272_v30 = vpack.c.bf16 %v1258_v29, %v1258_v29  ;;  %v1032_v32 = vsel %vm1028_vm6, 0.0, %v1024_v23  ;;  %v1261_v31 = vsel %vm1028_vm6, 1.0, %v1695_v13  ;;  %vm1026_vm7 = vcmp.ge.f32.partialorder %v1022_v26, 1.0 }
 0x604   : > { %1064 = vst.msk [vmem:[%s1973_s17 + $0x8] sm:$0xf] %vm1061_vm4, %v1274_v27  ;;  %v1275_v33 = vpack.c.bf16 %v1261_v31, %v1261_v31  ;;  %v1030_v35 = vsel %vm1026_vm7, 0.0, %v1022_v26  ;;  %v1259_v37 = vsel %vm1026_vm7, 1.0, %v1695_v13 }
 0x605   : > { %1036 = vst.msk [vmem:[#allocation4 + $0x18] sm:$0xff] %vm422_vm1, %v1032_v32  ;;  %1034 = vst.msk [vmem:[#allocation4 + $0x8] sm:$0xff] %vm422_vm1, %v1030_v35  ;;  %v1273_v34 = vpack.c.bf16 %v1259_v37, %v1259_v37 }
 0x606   : > { %1062 = vst.msk [vmem:[%s1973_s17] sm:$0xf] %vm1061_vm4, %v1272_v30  ;;  %1065 = vst.msk [vmem:[%s1973_s17 + $0xc] sm:$0xf] %vm1061_vm4, %v1275_v33 }
 0x607   : > { %1063 = vst.msk [vmem:[%s1973_s17 + $0x4] sm:$0xf] %vm1061_vm4, %v1273_v34 }
 0x608   : > { %1606 = shalt.err (!%p1603_p4)
}
 0x609   : > { %s1607_s17 = scalar_lea.hbm %s2106_s27, 256  ;;  %s1611_s30 = scalar_lea.hbm %s2198_s14, 512 }
 0x60a   : > { %p1608_p2 = scmp.ne.s32.totalorder %s2106_s27, %s1607_s17  ;;  %p1612_p1 = scmp.lt.u32.totalorder %s2106_s27, %s2198_s14 }
 0x60b   : > { %p1613_p11 = scmp.lt.u32.totalorder %s1611_s30, %s1607_s17  ;;  %p1615_p6 = scmp.lt.u32.totalorder %s1607_s17, %s2106_s27 }
 0x60c   : > { %p1609_p8 = pnand %p1608_p2, %p1893_p10 }
 0x60d   : > { %p1614_p13 = por %p1613_p11, %p1612_p1 }
 0x60e   : > { %p1610_p12 = pneg %p1609_p8 }
 0x60f   : > { %p1616_p3 = por %p1615_p6, %p1614_p13 }
 0x611   : > { %p1617_p5 = pnand %p1616_p3, %p1610_p12 }
 0x613   : > { %1620 = shalt.err (!%p1617_p5)
}
 0x614   : > { %s1700_s24 = smov 4  }
 0x615   : > { %1373 = dma.vmem_to_hbm [thread:$0]  (%p1893_p10), %s2111_s21, 256, %s2106_s27, %s1067_s16, %s1697_s18, %s1697_s18, %s1700_s24  }
 0x616 PF: > { %s2199_s12 = sld [smem:[#allocation18_spill]]  ;;  %s2200_s10 = sld [smem:[#allocation19_spill]] }
 0x617   : > { %p2202_p9 = scmp.ge.s32.totalorder %s1683_s26, 2 }
 0x61c   : > { %s1097_s15 = sand.u32 1, %s2199_s12   ;;  %p2201_p7 = scmp.ne.s32.totalorder %s2200_s10, 0 }
 0x61d   : > { %s1098_s11 = scalar_lea.sflag [#allocation7], %s1097_s15 }
 0x61e   : > { %p1390_p0 = pnand %p2202_p9, %p2201_p7 }
 0x620   : > { %1658 = dma.done.wait (!%p1390_p0), %s1098_s11, 256  }
 0x621   : > { %1660 = vsyncadd (!%p1390_p0), %s1098_s11, 4294967040  ;;  %s24_s26 = sadd.s32 1, %s1683_s26   ;;  %s2203_s21 = smov %s1667_s22 }
 0x622   : > { %p21_p4 = scmp.ge.s32.totalorder %s24_s26, 4   ;;  %s2204_s22 = smov %s1671_s23 }
 0x623   : > { %s2205_s23 = smov %s1905_s13  ;;  %s2206_s24 = smov %s1679_s25 }
 0x624   : > { %s2207_s25 = smov %s2209_s19  ;;  %23 = sbr.rel (!%p21_p4) target bundleno = 10 (0xa), region = 105 }
 0x62b   :  { %1103 = vsyncpa [#allocation6], 1 }
 0x62c   :  { %1105 = vsyncpa [#allocation6 + $0x1], 1 }
 0x62d   :  { %1106 = vsyncpa [#allocation9], 1 }
 0x62e   :  { %1107 = vsyncpa [#allocation12], 1 }
 0x62f   :  { %1108 = vsyncpa [#allocation7], 1 }
 0x630   :  { %1110 = vsyncpa [#allocation7 + $0x1], 1 }

</bundles_post_ra>
